<compile_context>
chip_gen: v6e
topology: v6e:2x2x1
jax: 0.10.0
libtpu: 0.0.40
codegen_flags: <defaults>
</compile_context>

<pallas_src>
import jax
import jax.numpy as jnp
from jax.experimental import pallas as pl
from jax.experimental.pallas import tpu as pltpu


def _round_up(a, b):
    return -(-a // b) * b


def _pick_pack():
    """Pixels packed per row.  8 -> 256-lane matmuls (fills v6e/v7x 256-wide MXU),
    4 -> 128-lane matmuls (native tile of v5e's 128x128 MXU).  Both are correct."""
    try:
        kind = jax.devices()[0].device_kind.lower()
    except Exception:
        return 8
    if "v5 lite" in kind or "v5e" in kind or "v5lite" in kind:
        return 4
    return 8


PACK = _pick_pack()


# ----------------------------------------------------------------------------
# Kernel: pure feed-forward per row tile (all branch logic pre-folded into the
# small weights), so every store is lane-dense and nothing gates the pipeline.
# ----------------------------------------------------------------------------
def _fused_kernel(x_ref, w12_ref, b12_ref, w3_ref, b3_ref, w4_ref, b4_ref, o_ref):
    # conv_pre + blended branch conv, collapsed into one matmul (pre-scaled so the
    # single EUP sigmoid serves both branches: tanh(x) = 2*sigmoid(2x) - 1).
    g = jnp.dot(x_ref[...], w12_ref[...],
                preferred_element_type=jnp.float32) + b12_ref[...]
    a = jax.nn.sigmoid(g)
    # conv_shared inside the branch; its weight carries the "2*" scale and its bias
    # carries the "-pred" of the tanh trick plus the branch's +/-1.
    y = jnp.dot(a, w3_ref[...], preferred_element_type=jnp.float32) + b3_ref[...]
    # outer conv_shared.
    z = jnp.dot(y, w4_ref[...], preferred_element_type=jnp.float32) + b4_ref[...]
    o_ref[...] = z  # (TILE, PACK*32): fully lane-dense store


# ----------------------------------------------------------------------------
# Wrapper: predicate + weight blending/folding (tiny XLA ops), packed layout,
# block-diagonal 1x1-conv weights, row-tiled pallas_call.
# ----------------------------------------------------------------------------
def _block_diag(w, pack):
    """(cin, cout) 1x1-conv weight -> pack-way block-diagonal (pack*cin, pack*cout)."""
    return jnp.kron(jnp.eye(pack, dtype=w.dtype), w)


def _tile_bias(b, pack):
    return jnp.tile(b.reshape(1, -1), (1, pack))


@jax.jit
def control_if_forward(x_nchw, params):
    N, C, H, W = x_nchw.shape
    c_out = params["w_shared"].shape[1]
    P = N * H * W

    # --- predicate: mean(conv_pre(x)) > 0, computed analytically (tiny) -------
    # sum(conv_pre(x)) = colsum(x) . rowsum(w_pre) + P * sum(b_pre)
    # NOTE: different f32 accumulation order than the reference; can only flip
    # when the mean is within rounding of zero (data-dependent, documented).
    csum_x = jnp.sum(x_nchw, axis=(0, 2, 3))                       # (C,)
    total = jnp.dot(csum_x, jnp.sum(params["w_pre"], axis=1)) \
        + P * jnp.sum(params["b_pre"])
    predf = (total > 0.0).astype(jnp.float32)                      # exactly 1.0 / 0.0
    s = 1.0 + predf                                                # 2 (tanh) / 1 (sigmoid)

    # --- blend branch weights and fold every scalar epilogue (O(K*N) work) ----
    w_b = predf * params["w_true"] + (1.0 - predf) * params["w_false"]
    b_b = predf * params["b_true"] + (1.0 - predf) * params["b_false"]
    ws, bs = params["w_shared"], params["b_shared"]

    w2 = s * w_b                                  # pre-scale: sigmoid(s * hb)
    b2 = s * b_b
    # conv_pre collapses into the blended branch conv (no nonlinearity between).
    w12 = params["w_pre"] @ w2                    # (3, 32)
    b12 = params["b_pre"] @ w2 + b2               # (1, 32)
    csum_ws = jnp.sum(ws, axis=0, keepdims=True)  # (1, 32)
    w3 = s * ws                                   # absorbs the "2*" of 2*sig(2x)-1
    b3 = bs - predf * csum_ws + (2.0 * predf - 1.0)  # absorbs "-pred" and the +/-1
    w4, b4 = ws, bs

    # --- pack PACK pixels per row (channels-last, lane-dense) -----------------
    x2d = jnp.transpose(x_nchw, (0, 2, 3, 1)).reshape(P, C)
    p4_raw = -(-P // PACK)
    tile = min(256, _round_up(p4_raw, 8))         # rows per grid step (mult of 8)
    p4 = _round_up(p4_raw, tile)
    n_pad = p4 * PACK - P
    if n_pad:                                     # padded rows are sliced off below
        x2d = jnp.pad(x2d, ((0, n_pad), (0, 0)))
    xp = x2d.reshape(p4, PACK * C)

    w12p = _block_diag(w12, PACK); b12p = _tile_bias(b12, PACK)
    w3p = _block_diag(w3, PACK);   b3p = _tile_bias(b3, PACK)
    w4p = _block_diag(w4, PACK);   b4p = _tile_bias(b4, PACK)

    cw = PACK * c_out
    grid = (p4 // tile,)

    # VMEM ask derived from actual buffer sizes (weights + double-buffered tiles
    # + per-step intermediates), instead of a blanket 48 MiB.
    weight_bytes = 4 * (w12p.size + b12p.size + w3p.size + b3p.size
                        + w4p.size + b4p.size)
    io_bytes = 2 * 4 * tile * (PACK * C + cw)        # double-buffered in/out tiles
    interm_bytes = 4 * tile * 3 * cw                 # g, a, y live per step
    vmem_limit = int(max(4 << 20, 2 * (weight_bytes + io_bytes + interm_bytes)))

    zp = pl.pallas_call(
        _fused_kernel,
        out_shape=jax.ShapeDtypeStruct((p4, cw), jnp.float32),
        grid=grid,
        in_specs=[
            pl.BlockSpec((tile, PACK * C), lambda i: (i, 0)),
            pl.BlockSpec(w12p.shape, lambda i: (0, 0)),   # resident across steps
            pl.BlockSpec(b12p.shape, lambda i: (0, 0)),
            pl.BlockSpec(w3p.shape, lambda i: (0, 0)),
            pl.BlockSpec(b3p.shape, lambda i: (0, 0)),
            pl.BlockSpec(w4p.shape, lambda i: (0, 0)),
            pl.BlockSpec(b4p.shape, lambda i: (0, 0)),
        ],
        out_specs=pl.BlockSpec((tile, cw), lambda i: (i, 0)),
        compiler_params=pltpu.CompilerParams(
            dimension_semantics=("parallel",),        # shards across v7x's 2 TCs
            vmem_limit_bytes=vmem_limit),
    )(xp, w12p, b12p, w3p, b3p, w4p, b4p)

    out2d = zp.reshape(p4 * PACK, c_out)[:P]          # drop padded pixels
    return jnp.transpose(out2d.reshape(N, H, W, c_out), (0, 3, 1, 2))


# ----------------------------------------------------------------------------
# Pure-JAX reference (mirrors the PyTorch module).
# ----------------------------------------------------------------------------
def reference_forward(x_nchw, params):
    def conv1x1(x, w, b):  # x: (N,Cin,H,W), w: (Cin,Cout), b: (1,Cout)
        y = jnp.einsum("nchw,cd->ndhw", x, w)
        return y + b[0][None, :, None, None]

    h = conv1x1(x_nchw, params["w_pre"], params["b_pre"])
    pred = jnp.mean(h) > 0

    def branch_true(h):
        a = jnp.tanh(conv1x1(h, params["w_true"], params["b_true"]))
        return conv1x1(a, params["w_shared"], params["b_shared"]) + 1.0

    def branch_false(h):
        a = jax.nn.sigmoid(conv1x1(h, params["w_false"], params["b_false"]))
        return conv1x1(a, params["w_shared"], params["b_shared"]) - 1.0

    y = jax.lax.cond(pred, branch_true, branch_false, h)
    return conv1x1(y, params["w_shared"], params["b_shared"])


def make_params(key):
    ks = jax.random.split(key, 8)

    def w(k, cin, cout):
        return (jax.random.normal(k, (cin, cout), jnp.float32)
                * (1.0 / jnp.sqrt(cin)))

    def b(k, cout):
        return jax.random.normal(k, (1, cout), jnp.float32) * 0.1

    return {
        "w_pre":    w(ks[0], 3, 16),  "b_pre":    b(ks[1], 16),
        "w_true":   w(ks[2], 16, 32), "b_true":   b(ks[3], 32),
        "w_false":  w(ks[4], 16, 32), "b_false":  b(ks[5], 32),
        "w_shared": w(ks[6], 32, 32), "b_shared": b(ks[7], 32),
    }


if __name__ == "__main__":
    key = jax.random.PRNGKey(0)
    k_x, k_p = jax.random.split(key)
    params = make_params(k_p)

    shapes = [
        (2, 3, 16, 16),     # small test shape
        (1, 3, 128, 128),   # the module's native input shape
        (1, 3, 7, 9),       # N*H*W not a multiple of PACK*8: exercises padding
    ]
    for idx, shape in enumerate(shapes):
        kx = k_x if idx == 0 else jax.random.fold_in(k_x, idx)
        x = jax.random.normal(kx, shape, jnp.float32)

        out = jax.block_until_ready(control_if_forward(x, params))
        ref = reference_forward(x, params)

        assert out.shape == (shape[0], 32, shape[2], shape[3]), out.shape
        err = float(jnp.max(jnp.abs(out - ref)))
        assert err < 5e-4, (shape, err)

    print("KERNEL_OK")
</pallas_src>

<mosaic_0001>
module attributes {stable_mosaic.version = 11 : i64} {
  func.func @_fused_kernel(%arg0: i32, %arg1: memref<64x24xf32, #tpu.memory_space<vmem>>, %arg2: memref<24x256xf32, #tpu.memory_space<vmem>>, %arg3: memref<1x256xf32, #tpu.memory_space<vmem>>, %arg4: memref<256x256xf32, #tpu.memory_space<vmem>>, %arg5: memref<1x256xf32, #tpu.memory_space<vmem>>, %arg6: memref<256x256xf32, #tpu.memory_space<vmem>>, %arg7: memref<1x256xf32, #tpu.memory_space<vmem>>, %arg8: memref<64x256xf32, #tpu.memory_space<vmem>>) attributes {dimension_semantics = [#tpu.dimension_semantics<parallel>], iteration_bounds = array<i64: 1>, scalar_prefetch = 0 : i64, scratch_operands = 0 : i64, tpu.core_type = #tpu.core_type<tc>, window_params = [{transform_indices = @transform_0, window_bounds = array<i64: 64, 24>}, {pipeline_mode = #tpu.pipeline_mode<synchronous>, transform_indices = @transform_1, window_bounds = array<i64: 24, 256>}, {pipeline_mode = #tpu.pipeline_mode<synchronous>, transform_indices = @transform_2, window_bounds = array<i64: 1, 256>}, {pipeline_mode = #tpu.pipeline_mode<synchronous>, transform_indices = @transform_3, window_bounds = array<i64: 256, 256>}, {pipeline_mode = #tpu.pipeline_mode<synchronous>, transform_indices = @transform_4, window_bounds = array<i64: 1, 256>}, {pipeline_mode = #tpu.pipeline_mode<synchronous>, transform_indices = @transform_5, window_bounds = array<i64: 256, 256>}, {pipeline_mode = #tpu.pipeline_mode<synchronous>, transform_indices = @transform_6, window_bounds = array<i64: 1, 256>}, {transform_indices = @transform_7, window_bounds = array<i64: 64, 256>}]} {
    %c0 = arith.constant 0 : index
    %c0_0 = arith.constant 0 : index
    %0 = vector.load %arg1[%c0, %c0_0] : memref<64x24xf32, #tpu.memory_space<vmem>>, vector<64x24xf32>
    %c0_1 = arith.constant 0 : index
    %c0_2 = arith.constant 0 : index
    %1 = vector.load %arg2[%c0_1, %c0_2] : memref<24x256xf32, #tpu.memory_space<vmem>>, vector<24x256xf32>
    %cst = arith.constant dense<0.000000e+00> : vector<64x256xf32>
    %2 = tpu.matmul %0, %1, %cst {dimension_numbers = #tpu.dot_dimension_numbers<[1], [0], [0], [1], [0, 0, 1, 1], [], []>} : vector<64x24xf32>, vector<24x256xf32>, vector<64x256xf32> -> vector<64x256xf32>
    %c0_3 = arith.constant 0 : index
    %c0_4 = arith.constant 0 : index
    %3 = vector.load %arg3[%c0_3, %c0_4] : memref<1x256xf32, #tpu.memory_space<vmem>>, vector<1x256xf32>
    %4 = vector.broadcast %3 : vector<1x256xf32> to vector<64x256xf32>
    %5 = arith.addf %2, %4 : vector<64x256xf32>
    %6 = arith.negf %5 : vector<64x256xf32>
    %7 = math.exp %6 : vector<64x256xf32>
    %cst_5 = arith.constant 1.000000e+00 : f32
    %8 = vector.broadcast %cst_5 : f32 to vector<64x256xf32>
    %9 = arith.addf %8, %7 : vector<64x256xf32>
    %10 = arith.divf %8, %9 : vector<64x256xf32>
    %c0_6 = arith.constant 0 : index
    %c0_7 = arith.constant 0 : index
    %11 = vector.load %arg4[%c0_6, %c0_7] : memref<256x256xf32, #tpu.memory_space<vmem>>, vector<256x256xf32>
    %cst_8 = arith.constant dense<0.000000e+00> : vector<64x256xf32>
    %12 = tpu.matmul %10, %11, %cst_8 {dimension_numbers = #tpu.dot_dimension_numbers<[1], [0], [0], [1], [0, 0, 1, 1], [], []>} : vector<64x256xf32>, vector<256x256xf32>, vector<64x256xf32> -> vector<64x256xf32>
    %c0_9 = arith.constant 0 : index
    %c0_10 = arith.constant 0 : index
    %13 = vector.load %arg5[%c0_9, %c0_10] : memref<1x256xf32, #tpu.memory_space<vmem>>, vector<1x256xf32>
    %14 = vector.broadcast %13 : vector<1x256xf32> to vector<64x256xf32>
    %15 = arith.addf %12, %14 : vector<64x256xf32>
    %c0_11 = arith.constant 0 : index
    %c0_12 = arith.constant 0 : index
    %16 = vector.load %arg6[%c0_11, %c0_12] : memref<256x256xf32, #tpu.memory_space<vmem>>, vector<256x256xf32>
    %cst_13 = arith.constant dense<0.000000e+00> : vector<64x256xf32>
    %17 = tpu.matmul %15, %16, %cst_13 {dimension_numbers = #tpu.dot_dimension_numbers<[1], [0], [0], [1], [0, 0, 1, 1], [], []>} : vector<64x256xf32>, vector<256x256xf32>, vector<64x256xf32> -> vector<64x256xf32>
    %c0_14 = arith.constant 0 : index
    %c0_15 = arith.constant 0 : index
    %18 = vector.load %arg7[%c0_14, %c0_15] : memref<1x256xf32, #tpu.memory_space<vmem>>, vector<1x256xf32>
    %19 = vector.broadcast %18 : vector<1x256xf32> to vector<64x256xf32>
    %20 = arith.addf %17, %19 : vector<64x256xf32>
    %c0_16 = arith.constant 0 : index
    %c0_17 = arith.constant 0 : index
    %21 = vector.load %arg8[%c0_16, %c0_17] : memref<64x256xf32, #tpu.memory_space<vmem>>, vector<64x256xf32>
    tpu.vector_store %arg8[%c0_16, %c0_17], %20 {strides = array<i32>} : memref<64x256xf32, #tpu.memory_space<vmem>>, vector<64x256xf32>,
    return
  }
  func.func @transform_0(%arg0: i32) -> (i32, i32) {
    %c0_i32 = arith.constant 0 : i32
    %c0_i32_0 = arith.constant 0 : i32
    return %arg0, %c0_i32 : i32, i32
  }
  func.func @transform_1(%arg0: i32) -> (i32, i32) {
    %c0_i32 = arith.constant 0 : i32
    %c0_i32_0 = arith.constant 0 : i32
    %c0_i32_1 = arith.constant 0 : i32
    return %c0_i32, %c0_i32_0 : i32, i32
  }
  func.func @transform_2(%arg0: i32) -> (i32, i32) {
    %c0_i32 = arith.constant 0 : i32
    %c0_i32_0 = arith.constant 0 : i32
    %c0_i32_1 = arith.constant 0 : i32
    return %c0_i32, %c0_i32_0 : i32, i32
  }
  func.func @transform_3(%arg0: i32) -> (i32, i32) {
    %c0_i32 = arith.constant 0 : i32
    %c0_i32_0 = arith.constant 0 : i32
    %c0_i32_1 = arith.constant 0 : i32
    return %c0_i32, %c0_i32_0 : i32, i32
  }
  func.func @transform_4(%arg0: i32) -> (i32, i32) {
    %c0_i32 = arith.constant 0 : i32
    %c0_i32_0 = arith.constant 0 : i32
    %c0_i32_1 = arith.constant 0 : i32
    return %c0_i32, %c0_i32_0 : i32, i32
  }
  func.func @transform_5(%arg0: i32) -> (i32, i32) {
    %c0_i32 = arith.constant 0 : i32
    %c0_i32_0 = arith.constant 0 : i32
    %c0_i32_1 = arith.constant 0 : i32
    return %c0_i32, %c0_i32_0 : i32, i32
  }
  func.func @transform_6(%arg0: i32) -> (i32, i32) {
    %c0_i32 = arith.constant 0 : i32
    %c0_i32_0 = arith.constant 0 : i32
    %c0_i32_1 = arith.constant 0 : i32
    return %c0_i32, %c0_i32_0 : i32, i32
  }
  func.func @transform_7(%arg0: i32) -> (i32, i32) {
    %c0_i32 = arith.constant 0 : i32
    %c0_i32_0 = arith.constant 0 : i32
    return %arg0, %c0_i32 : i32, i32
  }
}

</mosaic_0001>

<bundles_post_ra>
// kernel: control_if_forward.1
= control target key start
LH: loop header
LB: loop body
LE: loop exit
PB: predicated region body
PF: predicated region fallthrough
CT: control target
= control target key end

     0   :  { %v773_v3 = vmov 0.0   ;;  %vm52_vm0 = vcmask 195584   ;;  %s1343_s1 = inlined_call_operand.vmem [shape: f32[24,256], index: 1, kind: input, shape index: {}]   ;;  %s1344_s0 = inlined_call_operand.vmem [shape: f32[64,24], index: 0, kind: input, shape index: {}]   ;;  %s1345_s3 = inlined_call_operand.vmem [shape: f32[256,256], index: 3, kind: input, shape index: {}]   ;;  %s1346_s5 = inlined_call_operand.vmem [shape: f32[256,256], index: 5, kind: input, shape index: {}]   ;;  %s1347_s2 = inlined_call_operand.vmem [shape: f32[1,256], index: 2, kind: input, shape index: {}]   ;;  %s1348_s4 = inlined_call_operand.vmem [shape: f32[1,256], index: 4, kind: input, shape index: {}]   ;;  %s1349_s6 = inlined_call_operand.vmem [shape: f32[1,256], index: 6, kind: input, shape index: {}]   ;;  %s1350_s7 = inlined_call_operand.vmem [shape: f32[64,256], index: 7, kind: output, shape index: {}]  }
   0x1   :  { %v39_v0 = vld [vmem:[%s1343_s1 + $0x28] sm:$0xff]  ;;  %v38_v1 = vld [vmem:[%s1343_s1 + $0x20] sm:$0xff]  ;;  %v37_v2 = vld [vmem:[%s1343_s1 + $0x18] sm:$0xff]  ;;  %141 = vmatprep.mubr.f32.mxu0 %v773_v3 }
   0x2   :  { %103 = vmatprep.subr.mxu0 %v39_v0  ;;  %v36_v4 = vld [vmem:[%s1343_s1 + $0x10] sm:$0xff]  ;;  %v35_v5 = vld [vmem:[%s1343_s1 + $0x8] sm:$0xff]  ;;  %v34_v6 = vld [vmem:[%s1343_s1] sm:$0xff] }
   0x3   :  { %104 = vmatpush1.msra.mxu0 %v38_v1  ;;  %v26_v7 = vld [vmem:[%s1344_s0] sm:$0xff]  ;;  %v317_v8 = vld [vmem:[%s1345_s3 + $0xf8] sm:$0xff]  ;;  %v316_v9 = vld [vmem:[%s1345_s3 + $0xf0] sm:$0xff] }
   0x4   :  { %105 = vmatprep.subr.mxu0 %v37_v2  ;;  %362 = vmatprep.subr.mxu1 %v317_v8  ;;  %v315_v10 = vld [vmem:[%s1345_s3 + $0xe8] sm:$0xff]  ;;  %v314_v11 = vld [vmem:[%s1345_s3 + $0xe0] sm:$0xff]  ;;  %v313_v12 = vld [vmem:[%s1345_s3 + $0xd8] sm:$0xff] }
   0x5   :  { %106 = vmatpush1.msra.mxu0 %v36_v4  ;;  %363 = vmatpush1.msra.mxu1 %v316_v9  ;;  %v312_v13 = vld [vmem:[%s1345_s3 + $0xd0] sm:$0xff]  ;;  %v27_v14 = vld [vmem:[%s1344_s0 + $0x8] sm:$0xff]  ;;  %v310_v16 = vld [vmem:[%s1345_s3 + $0xc0] sm:$0xff] }
   0x6   :  { %107 = vmatprep.subr.mxu0 %v35_v5  ;;  %364 = vmatprep.subr.mxu1 %v315_v10  ;;  %v311_v15 = vld [vmem:[%s1345_s3 + $0xc8] sm:$0xff]  ;;  %v309_v17 = vld [vmem:[%s1345_s3 + $0xb8] sm:$0xff]  ;;  %v308_v18 = vld [vmem:[%s1345_s3 + $0xb0] sm:$0xff] }
   0x7   :  { %108 = vmatpush1.msra.mxu0 %v34_v6  ;;  %365 = vmatpush1.msra.mxu1 %v314_v11  ;;  %v28_v19 = vld [vmem:[%s1344_s0 + $0x10] sm:$0xff]  ;;  %v307_v20 = vld [vmem:[%s1345_s3 + $0xa8] sm:$0xff]  ;;  %v306_v21 = vld [vmem:[%s1345_s3 + $0xa0] sm:$0xff] }
   0x8   :  { %684 = vmatmul.mubr.msk.f32.vlgmr.msra.gmra.mxu0 %vm52_vm0, %v26_v7  ;;  %366 = vmatprep.subr.mxu1 %v313_v12  ;;  %v305_v22 = vld [vmem:[%s1345_s3 + $0x98] sm:$0xff]  ;;  %v304_v23 = vld [vmem:[%s1345_s3 + $0x90] sm:$0xff]  ;;  %v303_v25 = vld [vmem:[%s1345_s3 + $0x88] sm:$0xff] }
   0x9   :  { %147 = vmatprep.mubr.f32.mxu0 %v773_v3  ;;  %367 = vmatpush1.msra.mxu1 %v312_v13  ;;  %v29_v24 = vld [vmem:[%s1344_s0 + $0x18] sm:$0xff]  ;;  %v302_v26 = vld [vmem:[%s1345_s3 + $0x80] sm:$0xff]  ;;  %v300_v28 = vld [vmem:[%s1345_s3 + $0x70] sm:$0xff] }
   0xa   :  { %368 = vmatprep.subr.mxu1 %v311_v15  ;;  %v301_v27 = vld [vmem:[%s1345_s3 + $0x78] sm:$0xff]  ;;  %v30_v29 = vld [vmem:[%s1344_s0 + $0x20] sm:$0xff]  ;;  %v299_v30 = vld [vmem:[%s1345_s3 + $0x68] sm:$0xff] }
   0xb   :  { %369 = vmatpush1.msra.mxu1 %v310_v16  ;;  %v298_v31 = vld [vmem:[%s1345_s3 + $0x60] sm:$0xff]  ;;  %v297_v32 = vld [vmem:[%s1345_s3 + $0x58] sm:$0xff]  ;;  %v296_v33 = vld [vmem:[%s1345_s3 + $0x50] sm:$0xff] }
   0xc   :  { %685 = vmatmul.mubr.msk.f32.gmra.mxu0 %vm52_vm0, %v27_v14  ;;  %370 = vmatprep.subr.mxu1 %v309_v17  ;;  %v31_v34 = vld [vmem:[%s1344_s0 + $0x28] sm:$0xff]  ;;  %v294_v36 = vld [vmem:[%s1345_s3 + $0x40] sm:$0xff]  ;;  %v293_v37 = vld [vmem:[%s1345_s3 + $0x38] sm:$0xff] }
   0xd   :  { %153 = vmatprep.mubr.f32.mxu0 %v773_v3  ;;  %371 = vmatpush1.msra.mxu1 %v308_v18  ;;  %v295_v35 = vld [vmem:[%s1345_s3 + $0x48] sm:$0xff]  ;;  %v292_v38 = vld [vmem:[%s1345_s3 + $0x30] sm:$0xff]  ;;  %v33_v40 = vld [vmem:[%s1344_s0 + $0x38] sm:$0xff] }
   0xe   :  { %372 = vmatprep.subr.mxu1 %v307_v20  ;;  %v32_v39 = vld [vmem:[%s1344_s0 + $0x30] sm:$0xff]  ;;  %v291_v41 = vld [vmem:[%s1345_s3 + $0x28] sm:$0xff]  ;;  %v290_v42 = vld [vmem:[%s1345_s3 + $0x20] sm:$0xff] }
   0xf   :  { %373 = vmatpush1.msra.mxu1 %v306_v21  ;;  %v289_v43 = vld [vmem:[%s1345_s3 + $0x18] sm:$0xff]  ;;  %v288_v44 = vld [vmem:[%s1345_s3 + $0x10] sm:$0xff]  ;;  %v287_v45 = vld [vmem:[%s1345_s3 + $0x8] sm:$0xff] }
  0x10   :  { %686 = vmatmul.mubr.msk.f32.gmra.mxu0 %vm52_vm0, %v28_v19  ;;  %374 = vmatprep.subr.mxu1 %v305_v22  ;;  %v286_v46 = vld [vmem:[%s1345_s3] sm:$0xff]  ;;  %v349_v47 = vld [vmem:[%s1345_s3 + $0x1f8] sm:$0xff]  ;;  %v348_v48 = vld [vmem:[%s1345_s3 + $0x1f0] sm:$0xff] }
  0x11   :  { %159 = vmatprep.mubr.f32.mxu0 %v773_v3  ;;  %375 = vmatpush1.msra.mxu1 %v304_v23  ;;  %v347_v49 = vld [vmem:[%s1345_s3 + $0x1e8] sm:$0xff]  ;;  %v346_v50 = vld [vmem:[%s1345_s3 + $0x1e0] sm:$0xff]  ;;  %v345_v51 = vld [vmem:[%s1345_s3 + $0x1d8] sm:$0xff] }
  0x12   :  { %376 = vmatprep.subr.mxu1 %v303_v25  ;;  %v344_v52 = vld [vmem:[%s1345_s3 + $0x1d0] sm:$0xff]  ;;  %v343_v53 = vld [vmem:[%s1345_s3 + $0x1c8] sm:$0xff]  ;;  %v342_v54 = vld [vmem:[%s1345_s3 + $0x1c0] sm:$0xff] }
  0x13   :  { %377 = vmatpush1.msra.mxu1 %v302_v26  ;;  %v341_v55 = vld [vmem:[%s1345_s3 + $0x1b8] sm:$0xff]  ;;  %v340_v56 = vld [vmem:[%s1345_s3 + $0x1b0] sm:$0xff]  ;;  %v339_v57 = vld [vmem:[%s1345_s3 + $0x1a8] sm:$0xff] }
  0x14   :  { %687 = vmatmul.mubr.msk.f32.gmra.mxu0 %vm52_vm0, %v29_v24  ;;  %378 = vmatprep.subr.mxu1 %v301_v27  ;;  %v338_v58 = vld [vmem:[%s1345_s3 + $0x1a0] sm:$0xff]  ;;  %v337_v59 = vld [vmem:[%s1345_s3 + $0x198] sm:$0xff]  ;;  %v336_v60 = vld [vmem:[%s1345_s3 + $0x190] sm:$0xff] }
  0x15   :  { %165 = vmatprep.mubr.f32.mxu0 %v773_v3  ;;  %379 = vmatpush1.msra.mxu1 %v300_v28  ;;  %v335_v61 = vld [vmem:[%s1345_s3 + $0x188] sm:$0xff]  ;;  %v334_v62 = vld [vmem:[%s1345_s3 + $0x180] sm:$0xff]  ;;  %v333_v63 = vld [vmem:[%s1345_s3 + $0x178] sm:$0xff] }
  0x16   :  { %380 = vmatprep.subr.mxu1 %v299_v30  ;;  %v332_v0 = vld [vmem:[%s1345_s3 + $0x170] sm:$0xff]  ;;  %v331_v1 = vld [vmem:[%s1345_s3 + $0x168] sm:$0xff]  ;;  %v330_v2 = vld [vmem:[%s1345_s3 + $0x160] sm:$0xff] }
  0x17   :  { %381 = vmatpush1.msra.mxu1 %v298_v31  ;;  %v328_v4 = vld [vmem:[%s1345_s3 + $0x150] sm:$0xff]  ;;  %v327_v5 = vld [vmem:[%s1345_s3 + $0x148] sm:$0xff]  ;;  %v326_v6 = vld [vmem:[%s1345_s3 + $0x140] sm:$0xff] }
  0x18   :  { %688 = vmatmul.mubr.msk.f32.gmra.mxu0 %vm52_vm0, %v30_v29  ;;  %382 = vmatprep.subr.mxu1 %v297_v32  ;;  %v325_v7 = vld [vmem:[%s1345_s3 + $0x138] sm:$0xff]  ;;  %v324_v8 = vld [vmem:[%s1345_s3 + $0x130] sm:$0xff]  ;;  %v323_v9 = vld [vmem:[%s1345_s3 + $0x128] sm:$0xff] }
  0x19   :  { %171 = vmatprep.mubr.f32.mxu0 %v773_v3  ;;  %383 = vmatpush1.msra.mxu1 %v296_v33  ;;  %v322_v10 = vld [vmem:[%s1345_s3 + $0x120] sm:$0xff]  ;;  %v321_v11 = vld [vmem:[%s1345_s3 + $0x118] sm:$0xff]  ;;  %v320_v12 = vld [vmem:[%s1345_s3 + $0x110] sm:$0xff] }
  0x1a   :  { %384 = vmatprep.subr.mxu1 %v295_v35  ;;  %v319_v13 = vld [vmem:[%s1345_s3 + $0x108] sm:$0xff]  ;;  %v318_v14 = vld [vmem:[%s1345_s3 + $0x100] sm:$0xff]  ;;  %v506_v15 = vld [vmem:[%s1346_s5 + $0xf8] sm:$0xff] }
  0x1b   :  { %385 = vmatpush1.msra.mxu1 %v294_v36  ;;  %v505_v16 = vld [vmem:[%s1346_s5 + $0xf0] sm:$0xff]  ;;  %v504_v17 = vld [vmem:[%s1346_s5 + $0xe8] sm:$0xff]  ;;  %551 = vmatprep.subr.mxu0 %v506_v15  ;;  %v503_v18 = vld [vmem:[%s1346_s5 + $0xe0] sm:$0xff] }
  0x1c   :  { %689 = vmatmul.mubr.msk.f32.gmra.mxu0 %vm52_vm0, %v31_v34  ;;  %386 = vmatprep.subr.mxu1 %v293_v37  ;;  %v502_v19 = vld [vmem:[%s1346_s5 + $0xd8] sm:$0xff]  ;;  %v501_v20 = vld [vmem:[%s1346_s5 + $0xd0] sm:$0xff]  ;;  %v500_v21 = vld [vmem:[%s1346_s5 + $0xc8] sm:$0xff] }
  0x1d   :  { %177 = vmatprep.mubr.f32.mxu0 %v773_v3  ;;  %387 = vmatpush1.msra.mxu1 %v292_v38  ;;  %v499_v22 = vld [vmem:[%s1346_s5 + $0xc0] sm:$0xff]  ;;  %v498_v23 = vld [vmem:[%s1346_s5 + $0xb8] sm:$0xff]  ;;  %v497_v24 = vld [vmem:[%s1346_s5 + $0xb0] sm:$0xff] }
  0x1e   :  { %388 = vmatprep.subr.mxu1 %v291_v41  ;;  %552 = vmatpush1.msra.mxu0 %v505_v16  ;;  %v496_v25 = vld [vmem:[%s1346_s5 + $0xa8] sm:$0xff]  ;;  %v495_v26 = vld [vmem:[%s1346_s5 + $0xa0] sm:$0xff]  ;;  %v494_v27 = vld [vmem:[%s1346_s5 + $0x98] sm:$0xff] }
  0x1f   :  { %389 = vmatpush1.msra.mxu1 %v290_v42  ;;  %553 = vmatprep.subr.mxu0 %v504_v17  ;;  %v493_v28 = vld [vmem:[%s1346_s5 + $0x90] sm:$0xff]  ;;  %v492_v29 = vld [vmem:[%s1346_s5 + $0x88] sm:$0xff]  ;;  %v491_v30 = vld [vmem:[%s1346_s5 + $0x80] sm:$0xff] }
  0x20   :  { %690 = vmatmul.mubr.msk.f32.gmra.mxu0 %vm52_vm0, %v32_v39  ;;  %390 = vmatprep.subr.mxu1 %v289_v43  ;;  %v490_v31 = vld [vmem:[%s1346_s5 + $0x78] sm:$0xff]  ;;  %v489_v32 = vld [vmem:[%s1346_s5 + $0x70] sm:$0xff]  ;;  %v488_v33 = vld [vmem:[%s1346_s5 + $0x68] sm:$0xff] }
  0x21   :  { %183 = vmatprep.mubr.f32.mxu0 %v773_v3  ;;  %391 = vmatpush1.msra.mxu1 %v288_v44  ;;  %v329_v3 = vld [vmem:[%s1345_s3 + $0x158] sm:$0xff]  ;;  %v487_v34 = vld [vmem:[%s1346_s5 + $0x60] sm:$0xff]  ;;  %v485_v36 = vld [vmem:[%s1346_s5 + $0x50] sm:$0xff] }
  0x22   :  { %392 = vmatprep.subr.mxu1 %v287_v45  ;;  %554 = vmatpush1.msra.mxu0 %v503_v18  ;;  %v486_v35 = vld [vmem:[%s1346_s5 + $0x58] sm:$0xff]  ;;  %v484_v37 = vld [vmem:[%s1346_s5 + $0x48] sm:$0xff]  ;;  %v483_v38 = vld [vmem:[%s1346_s5 + $0x40] sm:$0xff] }
  0x23   :  { %393 = vmatpush1.msra.mxu1 %v286_v46  ;;  %555 = vmatprep.subr.mxu0 %v502_v19  ;;  %v482_v39 = vld [vmem:[%s1346_s5 + $0x38] sm:$0xff]  ;;  %v480_v41 = vld [vmem:[%s1346_s5 + $0x28] sm:$0xff]  ;;  %v479_v42 = vld [vmem:[%s1346_s5 + $0x20] sm:$0xff] }
  0x24   :  { %691 = vmatmul.mubr.msk.f32.gmra.mxu0 %vm52_vm0, %v33_v40  ;;  %394 = vmatprep.subr.mxu1 %v349_v47  ;;  %v481_v40 = vld [vmem:[%s1346_s5 + $0x30] sm:$0xff]  ;;  %v478_v43 = vld [vmem:[%s1346_s5 + $0x18] sm:$0xff]  ;;  %v476_v45 = vld [vmem:[%s1346_s5 + $0x8] sm:$0xff] }
  0x25   :  { %395 = vmatpush2.msra.mxu1 %v348_v48  ;;  %556 = vmatpush1.msra.mxu0 %v501_v20  ;;  %v477_v44 = vld [vmem:[%s1346_s5 + $0x10] sm:$0xff]  ;;  %v475_v46 = vld [vmem:[%s1346_s5] sm:$0xff]  ;;  %v538_v47 = vld [vmem:[%s1346_s5 + $0x1f8] sm:$0xff] }
  0x26   :  { %396 = vmatprep.subr.mxu1 %v347_v49  ;;  %557 = vmatprep.subr.mxu0 %v500_v21  ;;  %v537_v48 = vld [vmem:[%s1346_s5 + $0x1f0] sm:$0xff]  ;;  %v536_v49 = vld [vmem:[%s1346_s5 + $0x1e8] sm:$0xff] }
  0x27   :  { %397 = vmatpush2.msra.mxu1 %v346_v50  ;;  %558 = vmatpush1.msra.mxu0 %v499_v22  ;;  %v535_v50 = vld [vmem:[%s1346_s5 + $0x1e0] sm:$0xff] }
  0x28   :  { %398 = vmatprep.subr.mxu1 %v345_v51  ;;  %559 = vmatprep.subr.mxu0 %v498_v23  ;;  %v534_v51 = vld [vmem:[%s1346_s5 + $0x1d8] sm:$0xff] }
  0x29   :  { %399 = vmatpush2.msra.mxu1 %v344_v52  ;;  %560 = vmatpush1.msra.mxu0 %v497_v24  ;;  %v533_v52 = vld [vmem:[%s1346_s5 + $0x1d0] sm:$0xff] }
  0x2a   :  { %400 = vmatprep.subr.mxu1 %v343_v53  ;;  %561 = vmatprep.subr.mxu0 %v496_v25  ;;  %v532_v53 = vld [vmem:[%s1346_s5 + $0x1c8] sm:$0xff] }
  0x2b   :  { %401 = vmatpush2.msra.mxu1 %v342_v54  ;;  %562 = vmatpush1.msra.mxu0 %v495_v26  ;;  %v531_v54 = vld [vmem:[%s1346_s5 + $0x1c0] sm:$0xff] }
  0x2c   :  { %402 = vmatprep.subr.mxu1 %v341_v55  ;;  %563 = vmatprep.subr.mxu0 %v494_v27  ;;  %v530_v55 = vld [vmem:[%s1346_s5 + $0x1b8] sm:$0xff] }
  0x2d   :  { %403 = vmatpush2.msra.mxu1 %v340_v56  ;;  %564 = vmatpush1.msra.mxu0 %v493_v28  ;;  %v529_v56 = vld [vmem:[%s1346_s5 + $0x1b0] sm:$0xff] }
  0x2e   :  { %404 = vmatprep.subr.mxu1 %v339_v57  ;;  %565 = vmatprep.subr.mxu0 %v492_v29  ;;  %v528_v57 = vld [vmem:[%s1346_s5 + $0x1a8] sm:$0xff] }
  0x2f   :  { %405 = vmatpush2.msra.mxu1 %v338_v58  ;;  %566 = vmatpush1.msra.mxu0 %v491_v30  ;;  %v527_v58 = vld [vmem:[%s1346_s5 + $0x1a0] sm:$0xff] }
  0x30   :  { %406 = vmatprep.subr.mxu1 %v337_v59  ;;  %567 = vmatprep.subr.mxu0 %v490_v31  ;;  %v526_v59 = vld [vmem:[%s1346_s5 + $0x198] sm:$0xff] }
  0x31   :  { %407 = vmatpush2.msra.mxu1 %v336_v60  ;;  %568 = vmatpush1.msra.mxu0 %v489_v32  ;;  %v525_v60 = vld [vmem:[%s1346_s5 + $0x190] sm:$0xff] }
  0x32   :  { %408 = vmatprep.subr.mxu1 %v335_v61  ;;  %569 = vmatprep.subr.mxu0 %v488_v33  ;;  %v524_v61 = vld [vmem:[%s1346_s5 + $0x188] sm:$0xff] }
  0x33   :  { %409 = vmatpush2.msra.mxu1 %v334_v62  ;;  %570 = vmatpush1.msra.mxu0 %v487_v34  ;;  %v42_v62 = vlaneseq }
  0x34   :  { %410 = vmatprep.subr.mxu1 %v333_v63  ;;  %571 = vmatprep.subr.mxu0 %v486_v35  ;;  %v523_v63 = vld [vmem:[%s1346_s5 + $0x180] sm:$0xff] }
  0x35   :  { %411 = vmatpush2.msra.mxu1 %v332_v0  ;;  %572 = vmatpush1.msra.mxu0 %v485_v36  ;;  %v522_v0 = vld [vmem:[%s1346_s5 + $0x178] sm:$0xff] }
  0x36   :  { %412 = vmatprep.subr.mxu1 %v331_v1  ;;  %573 = vmatprep.subr.mxu0 %v484_v37  ;;  %v521_v1 = vld [vmem:[%s1346_s5 + $0x170] sm:$0xff] }
  0x37   :  { %413 = vmatpush2.msra.mxu1 %v330_v2  ;;  %574 = vmatpush1.msra.mxu0 %v483_v38  ;;  %v520_v2 = vld [vmem:[%s1346_s5 + $0x168] sm:$0xff] }
  0x38   :  { %414 = vmatprep.subr.mxu1 %v329_v3  ;;  %575 = vmatprep.subr.mxu0 %v482_v39  ;;  %v43_v3 = vshrl.u32 %v42_v62, 7 }
  0x39   :  { %415 = vmatpush2.msra.mxu1 %v328_v4  ;;  %576 = vmatpush1.msra.mxu0 %v481_v40  ;;  %v519_v4 = vld [vmem:[%s1346_s5 + $0x160] sm:$0xff] }
  0x3a   :  { %416 = vmatprep.subr.mxu1 %v327_v5  ;;  %577 = vmatprep.subr.mxu0 %v480_v41  ;;  %v518_v5 = vld [vmem:[%s1346_s5 + $0x158] sm:$0xff] }
  0x3b   :  { %417 = vmatpush2.msra.mxu1 %v326_v6  ;;  %578 = vmatpush1.msra.mxu0 %v479_v42  ;;  %v517_v6 = vld [vmem:[%s1346_s5 + $0x150] sm:$0xff] }
  0x3c   :  { %418 = vmatprep.subr.mxu1 %v325_v7  ;;  %579 = vmatprep.subr.mxu0 %v478_v43  ;;  %v516_v7 = vld [vmem:[%s1346_s5 + $0x148] sm:$0xff] }
  0x3d   :  { %419 = vmatpush2.msra.mxu1 %v324_v8  ;;  %580 = vmatpush1.msra.mxu0 %v477_v44  ;;  %v1229_v8 = vsub.s32 0, %v43_v3 }
  0x3e   :  { %420 = vmatprep.subr.mxu1 %v323_v9  ;;  %581 = vmatprep.subr.mxu0 %v476_v45  ;;  %v515_v9 = vld [vmem:[%s1346_s5 + $0x140] sm:$0xff] }
  0x3f   :  { %421 = vmatpush2.msra.mxu1 %v322_v10  ;;  %582 = vmatpush1.msra.mxu0 %v475_v46  ;;  %v40_v10 = vld [vmem:[%s1347_s2] sm:$0x3] }
  0x40   :  { %422 = vmatprep.subr.mxu1 %v321_v11  ;;  %583 = vmatprep.subr.mxu0 %v538_v47  ;;  %v514_v11 = vld [vmem:[%s1346_s5 + $0x138] sm:$0xff] }
  0x41   :  { %423 = vmatpush2.msra.mxu1 %v320_v12  ;;  %584 = vmatpush2.msra.mxu0 %v537_v48  ;;  %v1240_v12 = vsub.s32 1, %v43_v3 }
  0x42   :  { %424 = vmatprep.subr.mxu1 %v319_v13  ;;  %585 = vmatprep.subr.mxu0 %v536_v49  ;;  %v513_v13 = vld [vmem:[%s1346_s5 + $0x130] sm:$0xff] }
  0x43   :  { %425 = vmatpush2.msra.mxu1 %v318_v14  ;;  %586 = vmatpush2.msra.mxu0 %v535_v50  ;;  %v1246_v14 = vrot.slane %v40_v10, %v1229_v8  ;;  %v1249_v15 = vrot.slane %v40_v10, %v1240_v12 }
  0x44   :  { %587 = vmatprep.subr.mxu0 %v534_v51 }
  0x45   :  { %588 = vmatpush2.msra.mxu0 %v533_v52 }
  0x46   :  { %589 = vmatprep.subr.mxu0 %v532_v53 }
  0x47   :  { %590 = vmatpush2.msra.mxu0 %v531_v54 }
  0x48   :  { %591 = vmatprep.subr.mxu0 %v530_v55 }
  0x49   :  { %592 = vmatpush2.msra.mxu0 %v529_v56 }
  0x4a   :  { %593 = vmatprep.subr.mxu0 %v528_v57 }
  0x4b   :  { %594 = vmatpush2.msra.mxu0 %v527_v58 }
  0x4c   :  { %595 = vmatprep.subr.mxu0 %v526_v59 }
  0x4d   :  { %596 = vmatpush2.msra.mxu0 %v525_v60 }
  0x4e   :  { %597 = vmatprep.subr.mxu0 %v524_v61 }
  0x4f   :  { %598 = vmatpush2.msra.mxu0 %v523_v63 }
  0x50   :  { %599 = vmatprep.subr.mxu0 %v522_v0 }
  0x51   :  { %600 = vmatpush2.msra.mxu0 %v521_v1 }
  0x52   :  { %601 = vmatprep.subr.mxu0 %v520_v2 }
  0x53   :  { %602 = vmatpush2.msra.mxu0 %v519_v4 }
  0x54   :  { %603 = vmatprep.subr.mxu0 %v518_v5 }
  0x55   :  { %604 = vmatpush2.msra.mxu0 %v517_v6 }
  0x56   :  { %605 = vmatprep.subr.mxu0 %v516_v7 }
  0x57   :  { %606 = vmatpush2.msra.mxu0 %v515_v9 }
  0x58   :  { %607 = vmatprep.subr.mxu0 %v514_v11 }
  0x59   :  { %608 = vmatpush2.msra.mxu0 %v513_v13 }
  0xc8   :  { %v143_v16 = vpop.f32.mrf.mxu0 }
  0xc9   :  { %v144_v17 = vadd.f32 %v143_v16, %v1246_v14 }
  0xca   :  { %v145_v18 = vpop.f32.mrf.mxu0 }
  0xcb   :  { %v692_v19 = vmul.f32 -1.442695, %v144_v17  ;;  %v146_v20 = vadd.f32 %v145_v18, %v1249_v15 }
  0xcc   :  { %v149_v21 = vpop.f32.mrf.mxu0 }
  0xcd   :  { %709 = vpow2.f32 %v692_v19  ;;  %v693_v22 = vmul.f32 -1.442695, %v146_v20  ;;  %v150_v23 = vadd.f32 %v149_v21, %v1246_v14 }
  0xce   :  { %v151_v24 = vpop.f32.mrf.mxu0 }
  0xcf   :  { %711 = vpow2.f32 %v693_v22  ;;  %v694_v25 = vmul.f32 -1.442695, %v150_v23  ;;  %v152_v26 = vadd.f32 %v151_v24, %v1249_v15 }
  0xd0   :  { %v155_v27 = vpop.f32.mrf.mxu0 }
  0xd1   :  { %713 = vpow2.f32 %v694_v25  ;;  %v695_v28 = vmul.f32 -1.442695, %v152_v26  ;;  %v156_v29 = vadd.f32 %v155_v27, %v1246_v14 }
  0xd2   :  { %v157_v30 = vpop.f32.mrf.mxu0 }
  0xd3   :  { %715 = vpow2.f32 %v695_v28  ;;  %v696_v31 = vmul.f32 -1.442695, %v156_v29  ;;  %v158_v32 = vadd.f32 %v157_v30, %v1249_v15 }
  0xd4   :  { %v161_v33 = vpop.f32.mrf.mxu0 }
  0xd5   :  { %717 = vpow2.f32 %v696_v31  ;;  %v697_v34 = vmul.f32 -1.442695, %v158_v32  ;;  %v162_v35 = vadd.f32 %v161_v33, %v1246_v14 }
  0xd6   :  { %v163_v36 = vpop.f32.mrf.mxu0 }
  0xd7   :  { %719 = vpow2.f32 %v697_v34  ;;  %v698_v37 = vmul.f32 -1.442695, %v162_v35  ;;  %v164_v38 = vadd.f32 %v163_v36, %v1249_v15 }
  0xd8   :  { %v167_v39 = vpop.f32.mrf.mxu0 }
  0xd9   :  { %721 = vpow2.f32 %v698_v37  ;;  %v699_v40 = vmul.f32 -1.442695, %v164_v38  ;;  %v168_v41 = vadd.f32 %v167_v39, %v1246_v14 }
  0xda   :  { %v710_v42 = vpop.eup %709  ;;  %v169_v43 = vpop.f32.mrf.mxu0 }
  0xdb   :  { %v238_v44 = vadd.f32 1.0, %v710_v42  ;;  %723 = vpow2.f32 %v699_v40  ;;  %v700_v45 = vmul.f32 -1.442695, %v168_v41  ;;  %v170_v46 = vadd.f32 %v169_v43, %v1249_v15 }
  0xdc   :  { %v712_v47 = vpop.eup %711  ;;  %v173_v48 = vpop.f32.mrf.mxu0 }
  0xdd   :  { %725 = vrcp.f32 %v238_v44  ;;  %v701_v49 = vmul.f32 -1.442695, %v170_v46  ;;  %v174_v50 = vadd.f32 %v173_v48, %v1246_v14  ;;  %v239_v51 = vadd.f32 1.0, %v712_v47 }
  0xde   :  { %v714_v52 = vpop.eup %713  ;;  %727 = vpow2.f32 %v700_v45  ;;  %v175_v53 = vpop.f32.mrf.mxu0 }
  0xdf   :  { %v240_v54 = vadd.f32 1.0, %v714_v52  ;;  %729 = vpow2.f32 %v701_v49  ;;  %v702_v55 = vmul.f32 -1.442695, %v174_v50  ;;  %v176_v56 = vadd.f32 %v175_v53, %v1249_v15  ;;  %v512_v50 = vld [vmem:[%s1346_s5 + $0x128] sm:$0xff]  ;;  %v510_v52 = vld [vmem:[%s1346_s5 + $0x118] sm:$0xff]  ;;  %v509_v53 = vld [vmem:[%s1346_s5 + $0x110] sm:$0xff] }
  0xe0   :  { %v716_v57 = vpop.eup %715  ;;  %v179_v58 = vpop.f32.mrf.mxu0  ;;  %731 = vrcp.f32 %v239_v51  ;;  %609 = vmatprep.subr.mxu0 %v512_v50  ;;  %v511_v51 = vld [vmem:[%s1346_s5 + $0x120] sm:$0xff] }
  0xe1   :  { %733 = vrcp.f32 %v240_v54  ;;  %v241_v59 = vadd.f32 1.0, %v716_v57  ;;  %v703_v60 = vmul.f32 -1.442695, %v176_v56  ;;  %v180_v61 = vadd.f32 %v179_v58, %v1246_v14  ;;  %610 = vmatpush2.msra.mxu0 %v511_v51  ;;  %v508_v54 = vld [vmem:[%s1346_s5 + $0x108] sm:$0xff]  ;;  %v350_v56 = vld [vmem:[%s1348_s4] sm:$0x3] }
  0xe2   :  { %v718_v62 = vpop.eup %717  ;;  %735 = vpow2.f32 %v702_v55  ;;  %v181_v63 = vpop.f32.mrf.mxu0  ;;  %611 = vmatprep.subr.mxu0 %v510_v52  ;;  %v507_v55 = vld [vmem:[%s1346_s5 + $0x100] sm:$0xff]  ;;  %v359_v57 = vrot.slane %v350_v56, %v1240_v12  ;;  %v355_v58 = vrot.slane %v350_v56, %v1229_v8 }
  0xe3   :  { %737 = vrcp.f32 %v241_v59  ;;  %v704_v0 = vmul.f32 -1.442695, %v180_v61  ;;  %v182_v1 = vadd.f32 %v181_v63, %v1249_v15  ;;  %v242_v4 = vadd.f32 1.0, %v718_v62  ;;  %612 = vmatpush2.msra.mxu0 %v509_v53 }
  0xe4   :  { %v720_v2 = vpop.eup %719  ;;  %739 = vpow2.f32 %v703_v60  ;;  %v185_v3 = vpop.f32.mrf.mxu0  ;;  %613 = vmatprep.subr.mxu0 %v508_v54 }
  0xe5   :  { %v243_v5 = vadd.f32 1.0, %v720_v2  ;;  %v705_v6 = vmul.f32 -1.442695, %v182_v1  ;;  %v186_v7 = vadd.f32 %v185_v3, %v1246_v14  ;;  %741 = vpow2.f32 %v704_v0  ;;  %614 = vmatpush2.msra.mxu0 %v507_v55 }
  0xe6   :  { %v722_v9 = vpop.eup %721  ;;  %v187_v10 = vpop.f32.mrf.mxu0 }
  0xe7   :  { %743 = vrcp.f32 %v243_v5  ;;  %v706_v11 = vmul.f32 -1.442695, %v186_v7  ;;  %v188_v13 = vadd.f32 %v187_v10, %v1249_v15  ;;  %v244_v17 = vadd.f32 1.0, %v722_v9 }
  0xe8   :  { %v724_v16 = vpop.eup %723  ;;  %745 = vpow2.f32 %v705_v6 }
  0xe9   :  { %747 = vrcp.f32 %v242_v4  ;;  %v245_v18 = vadd.f32 1.0, %v724_v16  ;;  %v707_v19 = vmul.f32 -1.442695, %v188_v13 }
  0xea   :  { %v726_v20 = vpop.eup %725  ;;  %749 = vpow2.f32 %v706_v11 }
  0xeb   :  { %v728_v21 = vpop.eup %727  ;;  %751 = vrcp.f32 %v245_v18 }
  0xec   :  { %v730_v22 = vpop.eup %729  ;;  %753 = vpow2.f32 %v707_v19  ;;  %v246_v23 = vadd.f32 1.0, %v728_v21 }
  0xed   :  { %v732_v14 = vpop.eup %731  ;;  %755 = vrcp.f32 %v244_v17  ;;  %v247_v24 = vadd.f32 1.0, %v730_v22 }
  0xee   :  { %v734_v25 = vpop.eup %733  ;;  %426 = vmatprep.mubr.f32.mxu1 %v732_v14 }
  0xef   :  { %v736_v26 = vpop.eup %735  ;;  %757 = vrcp.f32 %v247_v24  ;;  %427 = vmatmul.mubr.f32.vlgmr.msra.gmra.mxu1 %v726_v20 }
  0xf0   :  { %v738_v15 = vpop.eup %737  ;;  %759 = vrcp.f32 %v246_v23  ;;  %v248_v28 = vadd.f32 1.0, %v736_v26 }
  0xf1   :  { %v740_v27 = vpop.eup %739  ;;  %432 = vmatprep.mubr.f32.mxu1 %v738_v15 }
  0xf2   :  { %v249_v29 = vadd.f32 1.0, %v740_v27  ;;  %v742_v30 = vpop.eup %741 }
  0xf3   :  { %433 = vmatmul.mubr.f32.gmra.mxu1 %v734_v25  ;;  %v250_v33 = vadd.f32 1.0, %v742_v30 }
  0xf4   :  { %v744_v31 = vpop.eup %743  ;;  %761 = vrcp.f32 %v249_v29  ;;  %v539_v29 = vld [vmem:[%s1349_s6] sm:$0x3] }
  0xf5   :  { %v746_v32 = vpop.eup %745  ;;  %763 = vrcp.f32 %v248_v28  ;;  %438 = vmatprep.mubr.f32.mxu1 %v744_v31  ;;  %v544_v30 = vrot.slane %v539_v29, %v1229_v8  ;;  %v548_v31 = vrot.slane %v539_v29, %v1240_v12 }
  0xf6   :  { %v748_v34 = vpop.eup %747  ;;  %v251_v35 = vadd.f32 1.0, %v746_v32 }
  0xf7   :  { %v750_v36 = vpop.eup %749  ;;  %439 = vmatmul.mubr.f32.gmra.mxu1 %v748_v34 }
  0xf8   :  { %v752_v37 = vpop.eup %751  ;;  %765 = vrcp.f32 %v251_v35  ;;  %v252_v39 = vadd.f32 1.0, %v750_v36 }
  0xf9   :  { %v754_v38 = vpop.eup %753  ;;  %767 = vrcp.f32 %v250_v33  ;;  %444 = vmatprep.mubr.f32.mxu1 %v752_v37 }
  0xfa   :  { %v756_v40 = vpop.eup %755  ;;  %v253_v41 = vadd.f32 1.0, %v754_v38 }
  0xfb   :  { %445 = vmatmul.mubr.f32.gmra.mxu1 %v756_v40 }
  0xfc   :  { %v758_v42 = vpop.eup %757  ;;  %769 = vrcp.f32 %v253_v41 }
  0xfd   :  { %771 = vrcp.f32 %v252_v39  ;;  %450 = vmatprep.mubr.f32.mxu1 %v758_v42  ;;  %v760_v43 = vpop.eup %759 }
  0xff   :  { %451 = vmatmul.mubr.f32.gmra.mxu1 %v760_v43 }
 0x101   :  { %v762_v44 = vpop.eup %761 }
 0x102   :  { %v764_v45 = vpop.eup %763  ;;  %456 = vmatprep.mubr.f32.mxu1 %v762_v44 }
 0x103   :  { %457 = vmatmul.mubr.f32.gmra.mxu1 %v764_v45 }
 0x105   :  { %v766_v46 = vpop.eup %765 }
 0x106   :  { %v768_v47 = vpop.eup %767  ;;  %462 = vmatprep.mubr.f32.mxu1 %v766_v46 }
 0x107   :  { %463 = vmatmul.mubr.f32.gmra.mxu1 %v768_v47 }
 0x109   :  { %v770_v48 = vpop.eup %769 }
 0x10a   :  { %v772_v49 = vpop.eup %771  ;;  %468 = vmatprep.mubr.f32.mxu1 %v770_v48 }
 0x10b   :  { %469 = vmatmul.mubr.f32.gmra.mxu1 %v772_v49 }
 0x1af   :  { %v428_v59 = vpop.f32.mrf.mxu1 }
 0x1b0   :  { %v429_v62 = vadd.f32 %v428_v59, %v355_v58 }
 0x1b1   :  { %v430_v60 = vpop.f32.mrf.mxu1 }
 0x1b2   :  { %v431_v61 = vadd.f32 %v430_v60, %v359_v57 }
 0x1b3   :  { %v434_v63 = vpop.f32.mrf.mxu1 }
 0x1b4   :  { %615 = vmatprep.mubr.f32.mxu0 %v431_v61  ;;  %v435_v2 = vadd.f32 %v434_v63, %v355_v58 }
 0x1b5   :  { %v436_v0 = vpop.f32.mrf.mxu1  ;;  %616 = vmatmul.mubr.f32.vlgmr.msra.gmra.mxu0 %v429_v62 }
 0x1b6   :  { %v437_v1 = vadd.f32 %v436_v0, %v359_v57 }
 0x1b7   :  { %v440_v3 = vpop.f32.mrf.mxu1 }
 0x1b8   :  { %621 = vmatprep.mubr.f32.mxu0 %v437_v1  ;;  %v441_v6 = vadd.f32 %v440_v3, %v355_v58 }
 0x1b9   :  { %v442_v4 = vpop.f32.mrf.mxu1  ;;  %622 = vmatmul.mubr.f32.gmra.mxu0 %v435_v2 }
 0x1ba   :  { %v443_v5 = vadd.f32 %v442_v4, %v359_v57 }
 0x1bb   :  { %v446_v7 = vpop.f32.mrf.mxu1 }
 0x1bc   :  { %627 = vmatprep.mubr.f32.mxu0 %v443_v5  ;;  %v447_v11 = vadd.f32 %v446_v7, %v355_v58 }
 0x1bd   :  { %v448_v9 = vpop.f32.mrf.mxu1  ;;  %628 = vmatmul.mubr.f32.gmra.mxu0 %v441_v6 }
 0x1be   :  { %v449_v10 = vadd.f32 %v448_v9, %v359_v57 }
 0x1bf   :  { %v452_v13 = vpop.f32.mrf.mxu1 }
 0x1c0   :  { %633 = vmatprep.mubr.f32.mxu0 %v449_v10  ;;  %v453_v18 = vadd.f32 %v452_v13, %v355_v58 }
 0x1c1   :  { %v454_v16 = vpop.f32.mrf.mxu1  ;;  %634 = vmatmul.mubr.f32.gmra.mxu0 %v447_v11 }
 0x1c2   :  { %v455_v17 = vadd.f32 %v454_v16, %v359_v57 }
 0x1c3   :  { %v458_v19 = vpop.f32.mrf.mxu1 }
 0x1c4   :  { %639 = vmatprep.mubr.f32.mxu0 %v455_v17  ;;  %v459_v22 = vadd.f32 %v458_v19, %v355_v58 }
 0x1c5   :  { %v460_v20 = vpop.f32.mrf.mxu1  ;;  %640 = vmatmul.mubr.f32.gmra.mxu0 %v453_v18 }
 0x1c6   :  { %v461_v21 = vadd.f32 %v460_v20, %v359_v57 }
 0x1c7   :  { %v464_v14 = vpop.f32.mrf.mxu1 }
 0x1c8   :  { %645 = vmatprep.mubr.f32.mxu0 %v461_v21  ;;  %v465_v25 = vadd.f32 %v464_v14, %v355_v58 }
 0x1c9   :  { %v466_v23 = vpop.f32.mrf.mxu1  ;;  %646 = vmatmul.mubr.f32.gmra.mxu0 %v459_v22 }
 0x1ca   :  { %v467_v24 = vadd.f32 %v466_v23, %v359_v57 }
 0x1cb   :  { %v470_v26 = vpop.f32.mrf.mxu1 }
 0x1cc   :  { %651 = vmatprep.mubr.f32.mxu0 %v467_v24  ;;  %v471_v28 = vadd.f32 %v470_v26, %v355_v58 }
 0x1cd   :  { %v472_v15 = vpop.f32.mrf.mxu1  ;;  %652 = vmatmul.mubr.f32.gmra.mxu0 %v465_v25 }
 0x1ce   :  { %v473_v27 = vadd.f32 %v472_v15, %v359_v57 }
 0x1d0   :  { %657 = vmatprep.mubr.f32.mxu0 %v473_v27 }
 0x1d1   :  { %658 = vmatmul.mubr.f32.gmra.mxu0 %v471_v28 }
 0x275   :  { %v617_v32 = vpop.f32.mrf.mxu0 }
 0x276   :  { %v618_v33 = vadd.f32 %v617_v32, %v544_v30 }
 0x277   :  { %v619_v34 = vpop.f32.mrf.mxu0 }
 0x278   :  { %664 = vst [vmem:[%s1350_s7] sm:$0xff] %v618_v33  ;;  %v620_v35 = vadd.f32 %v619_v34, %v548_v31 }
 0x279   :  { %v623_v36 = vpop.f32.mrf.mxu0 }
 0x27a   :  { %665 = vst [vmem:[%s1350_s7 + $0x8] sm:$0xff] %v620_v35  ;;  %v624_v37 = vadd.f32 %v623_v36, %v544_v30 }
 0x27b   :  { %v625_v38 = vpop.f32.mrf.mxu0 }
 0x27c   :  { %666 = vst [vmem:[%s1350_s7 + $0x10] sm:$0xff] %v624_v37  ;;  %v626_v8 = vadd.f32 %v625_v38, %v548_v31 }
 0x27d   :  { %v629_v12 = vpop.f32.mrf.mxu0 }
 0x27e   :  { %667 = vst [vmem:[%s1350_s7 + $0x18] sm:$0xff] %v626_v8  ;;  %v630_v39 = vadd.f32 %v629_v12, %v544_v30 }
 0x27f   :  { %v631_v40 = vpop.f32.mrf.mxu0 }
 0x280   :  { %668 = vst [vmem:[%s1350_s7 + $0x20] sm:$0xff] %v630_v39  ;;  %v632_v41 = vadd.f32 %v631_v40, %v548_v31 }
 0x281   :  { %v635_v42 = vpop.f32.mrf.mxu0 }
 0x282   :  { %669 = vst [vmem:[%s1350_s7 + $0x28] sm:$0xff] %v632_v41  ;;  %v636_v43 = vadd.f32 %v635_v42, %v544_v30 }
 0x283   :  { %v637_v44 = vpop.f32.mrf.mxu0 }
 0x284   :  { %670 = vst [vmem:[%s1350_s7 + $0x30] sm:$0xff] %v636_v43  ;;  %v638_v45 = vadd.f32 %v637_v44, %v548_v31 }
 0x285   :  { %v641_v46 = vpop.f32.mrf.mxu0 }
 0x286   :  { %671 = vst [vmem:[%s1350_s7 + $0x38] sm:$0xff] %v638_v45  ;;  %v642_v47 = vadd.f32 %v641_v46, %v544_v30 }
 0x287   :  { %v643_v48 = vpop.f32.mrf.mxu0 }
 0x288   :  { %672 = vst [vmem:[%s1350_s7 + $0x40] sm:$0xff] %v642_v47  ;;  %v644_v49 = vadd.f32 %v643_v48, %v548_v31 }
 0x289   :  { %v647_v50 = vpop.f32.mrf.mxu0 }
 0x28a   :  { %673 = vst [vmem:[%s1350_s7 + $0x48] sm:$0xff] %v644_v49  ;;  %v648_v51 = vadd.f32 %v647_v50, %v544_v30 }
 0x28b   :  { %v649_v52 = vpop.f32.mrf.mxu0 }
 0x28c   :  { %674 = vst [vmem:[%s1350_s7 + $0x50] sm:$0xff] %v648_v51  ;;  %v650_v53 = vadd.f32 %v649_v52, %v548_v31 }
 0x28d   :  { %v653_v54 = vpop.f32.mrf.mxu0 }
 0x28e   :  { %675 = vst [vmem:[%s1350_s7 + $0x58] sm:$0xff] %v650_v53  ;;  %v654_v55 = vadd.f32 %v653_v54, %v544_v30 }
 0x28f   :  { %v655_v56 = vpop.f32.mrf.mxu0 }
 0x290   :  { %676 = vst [vmem:[%s1350_s7 + $0x60] sm:$0xff] %v654_v55  ;;  %v656_v57 = vadd.f32 %v655_v56, %v548_v31 }
 0x291   :  { %v659_v58 = vpop.f32.mrf.mxu0 }
 0x292   :  { %677 = vst [vmem:[%s1350_s7 + $0x68] sm:$0xff] %v656_v57  ;;  %v660_v59 = vadd.f32 %v659_v58, %v544_v30 }
 0x293   :  { %v661_v60 = vpop.f32.mrf.mxu0 }
 0x294   :  { %678 = vst [vmem:[%s1350_s7 + $0x70] sm:$0xff] %v660_v59  ;;  %v662_v61 = vadd.f32 %v661_v60, %v548_v31 }
 0x296   :  { %679 = vst [vmem:[%s1350_s7 + $0x78] sm:$0xff] %v662_v61 }

</bundles_post_ra>
